<compile_context>
chip_gen: v7x
topology: tpu7x:2x2x1
jax: 0.10.0
libtpu: 0.0.40
codegen_flags: <defaults>
</compile_context>

<pallas_src>
import functools

import jax
import jax.numpy as jnp
from jax.experimental import pallas as pl
from jax.experimental.pallas import tpu as pltpu


def _round_up(x, m):
    return ((x + m - 1) // m) * m


# ---------------------------------------------------------------------------
# Kernels
# ---------------------------------------------------------------------------

def _linear_single_k_kernel(x_ref, w_ref, b_ref, o_ref):
    """Whole vocab contraction in one tile. grid = (M, N); no scratch, no when.

    x_ref: (tm, Vp)   w_ref: (Vp, tn)   b_ref: (1, tn)   o_ref: (tm, tn) f32
    """
    o_ref[...] = b_ref[...] + jnp.dot(
        x_ref[...], w_ref[...], preferred_element_type=jnp.float32)


def _linear_k_reduce_kernel(x_ref, w_ref, b_ref, o_ref):
    """K-tiled contraction. The f32 output block's index ignores k, so it stays
    VMEM-resident across the reduction and is used directly as the accumulator
    (initialized with the bias at k == 0) — no acc scratch, no finalize copy.

    x_ref: (tm, tk)   w_ref: (tk, tn)   b_ref: (1, tn)   o_ref: (tm, tn) f32
    """
    k = pl.program_id(2)

    @pl.when(k == 0)
    def _():
        o_ref[...] = jnp.broadcast_to(b_ref[...], o_ref.shape)

    o_ref[...] += jnp.dot(
        x_ref[...], w_ref[...], preferred_element_type=jnp.float32)


# ---------------------------------------------------------------------------
# Tile policy + one-time parameter preparation
# ---------------------------------------------------------------------------

_TN_CAP = 512           # labels tile cap (128-aligned; 256-multiples preferred)
_TK_CAP = 2048          # vocab tile when the K axis is needed
_SINGLE_K_LIMIT = 4096  # take the whole padded vocab in one tile up to this


def _pick_label_vocab_tiles(num_labels, vocab_size):
    lp128 = _round_up(num_labels, 128)
    if lp128 >= 256:
        # Split N into >= 2 blocks when possible so both v7x TCs get work.
        tn = min(_round_up(lp128 // 2, 128), _TN_CAP)
    else:
        tn = lp128
    vp128 = _round_up(vocab_size, 128)
    tk = vp128 if vp128 <= _SINGLE_K_LIMIT else _TK_CAP
    return tn, tk


def prepare_linear_params(weight, bias, *, tn=None, tk=None):
    """One-time (per-parameter, not per-call) layout prep.

    weight: [num_labels, vocab] (PyTorch nn.Linear layout); bias: [num_labels].
    Returns (w_vl, b_row, meta) where w_vl is padded + transposed to
    [Vp, Lp] and b_row is the padded bias as a (1, Lp) row.
    """
    num_labels, vocab_size = weight.shape
    auto_tn, auto_tk = _pick_label_vocab_tiles(num_labels, vocab_size)
    tn = auto_tn if tn is None else tn
    tk = auto_tk if tk is None else tk
    Lp = _round_up(num_labels, tn)
    Vp = _round_up(vocab_size, tk)

    w_vl = jnp.pad(weight.astype(jnp.float32),
                   ((0, Lp - num_labels), (0, Vp - vocab_size))).T  # [Vp, Lp]
    b_row = jnp.pad(bias.astype(jnp.float32),
                    (0, Lp - num_labels)).reshape(1, Lp)
    meta = dict(num_labels=int(num_labels), vocab_size=int(vocab_size),
                tn=int(tn), tk=int(tk))
    return w_vl, b_row, meta


# ---------------------------------------------------------------------------
# Forward
# ---------------------------------------------------------------------------

@functools.partial(
    jax.jit,
    static_argnames=("num_labels", "vocab_size", "tn", "tk", "force_pallas"))
def simple_neural_network_forward(x, w_vl, b_row, *, num_labels, vocab_size,
                                  tn, tk, force_pallas=False):
    """x: [B, vocab]. Returns x @ W^T + b -> [B, num_labels]."""
    B = x.shape[0]
    Vp, Lp = w_vl.shape
    out_dtype = x.dtype

    # Tiny-problem fast path: below a few MFLOP the pallas_call machinery is
    # pure overhead; let XLA fuse the dot instead (perf-review item).
    if not force_pallas and 2 * B * vocab_size * num_labels < (1 << 22):
        out = (x.astype(jnp.float32) @ w_vl[:vocab_size, :num_labels]
               + b_row[0, :num_labels])
        return out.astype(out_dtype)

    tm = min(_round_up(B, 8), 256)
    Bp = _round_up(B, tm)

    xp = x.astype(jnp.float32)
    if (Bp, Vp) != (B, x.shape[1]):
        # Zero-padded vocab columns hit zero-padded weight rows -> contribute 0.
        xp = jnp.pad(xp, ((0, Bp - B), (0, Vp - x.shape[1])))

    grid_m, grid_n, grid_k = Bp // tm, Lp // tn, Vp // tk

    # VMEM budget: double-buffered x/W tiles + output/bias, with headroom.
    # Keep <= 48 MiB so it also fits v7x (64 MiB physical / 32 MiB scoped
    # default); raises v5e's 16 MiB scoped default.
    working = 2 * (tm * tk + tk * tn) * 4 + 2 * (tm * tn + tn) * 4
    vmem_limit = int(min(max(2 * working, 32 * 1024 * 1024), 48 * 1024 * 1024))

    cost = pl.CostEstimate(
        flops=2 * B * vocab_size * num_labels,
        transcendentals=0,
        bytes_accessed=4 * (xp.size + w_vl.size + b_row.size + Bp * Lp),
    )

    if grid_k == 1:
        out_p = pl.pallas_call(
            _linear_single_k_kernel,
            out_shape=jax.ShapeDtypeStruct((Bp, Lp), jnp.float32),
            grid_spec=pltpu.PrefetchScalarGridSpec(
                num_scalar_prefetch=0,
                grid=(grid_m, grid_n),
                in_specs=[
                    pl.BlockSpec((tm, Vp), lambda i, j: (i, 0)),   # x
                    pl.BlockSpec((Vp, tn), lambda i, j: (0, j)),   # W [V, L]
                    pl.BlockSpec((1, tn), lambda i, j: (0, j)),    # bias
                ],
                out_specs=pl.BlockSpec((tm, tn), lambda i, j: (i, j)),
            ),
            compiler_params=pltpu.CompilerParams(
                dimension_semantics=("parallel", "parallel"),
                vmem_limit_bytes=vmem_limit),
            cost_estimate=cost,
        )(xp, w_vl, b_row)
    else:
        out_p = pl.pallas_call(
            _linear_k_reduce_kernel,
            out_shape=jax.ShapeDtypeStruct((Bp, Lp), jnp.float32),
            grid_spec=pltpu.PrefetchScalarGridSpec(
                num_scalar_prefetch=0,
                grid=(grid_m, grid_n, grid_k),
                in_specs=[
                    pl.BlockSpec((tm, tk), lambda i, j, k: (i, k)),   # x
                    pl.BlockSpec((tk, tn), lambda i, j, k: (k, j)),   # W [V, L]
                    pl.BlockSpec((1, tn), lambda i, j, k: (0, j)),    # bias
                ],
                out_specs=pl.BlockSpec((tm, tn), lambda i, j, k: (i, j)),
            ),
            compiler_params=pltpu.CompilerParams(
                dimension_semantics=("parallel", "parallel", "arbitrary"),
                vmem_limit_bytes=vmem_limit),
            cost_estimate=cost,
        )(xp, w_vl, b_row)

    return out_p[:B, :num_labels].astype(out_dtype)


# ---------------------------------------------------------------------------
# Self-test
# ---------------------------------------------------------------------------

def _run_case(key, batch, vocab_size, num_labels, *, tn=None, tk=None,
              force_pallas=True):
    kx, kw, kb = jax.random.split(key, 3)
    bound = 1.0 / (vocab_size ** 0.5)
    weight = jax.random.uniform(kw, (num_labels, vocab_size), jnp.float32,
                                minval=-bound, maxval=bound)
    bias = jax.random.uniform(kb, (num_labels,), jnp.float32,
                              minval=-bound, maxval=bound)
    x = jax.random.normal(kx, (batch, vocab_size), jnp.float32)

    w_vl, b_row, meta = prepare_linear_params(weight, bias, tn=tn, tk=tk)
    out = simple_neural_network_forward(
        x, w_vl, b_row, force_pallas=force_pallas, **meta)
    out = jax.block_until_ready(out)

    ref = x @ weight.T + bias
    assert out.shape == (batch, num_labels), out.shape
    assert jnp.allclose(out, ref, atol=1e-4, rtol=1e-4), (
        f"mismatch: max abs err {jnp.max(jnp.abs(out - ref))}")
    return out


if __name__ == "__main__":
    key = jax.random.PRNGKey(0)
    k1, k2, k3 = jax.random.split(key, 3)

    # 1) Aligned shapes, single-K-tile path (grid = (M, N), no reduction axis).
    _run_case(k1, batch=8, vocab_size=512, num_labels=256)

    # 2) Unaligned shapes + forced small tk to exercise the K-reduction kernel
    #    (padding, bias-init at k==0, in-place f32 output accumulation, slice).
    _run_case(k2, batch=5, vocab_size=1000, num_labels=200, tk=256)

    # 3) Toy module-sized problem (8 x 32 -> 16): tiny-problem fast path
    #    (plain fused XLA dot), matching the original module's scale.
    _run_case(k3, batch=8, vocab_size=32, num_labels=16, force_pallas=False)

    print("KERNEL_OK")
</pallas_src>

<mosaic_0001>
module attributes {stable_mosaic.version = 11 : i64} {
  func.func @_linear_single_k_kernel(%arg0: i32, %arg1: i32, %arg2: memref<8x512xf32, #tpu.memory_space<vmem>>, %arg3: memref<512x128xf32, #tpu.memory_space<vmem>>, %arg4: memref<1x128xf32, #tpu.memory_space<vmem>>, %arg5: memref<8x128xf32, #tpu.memory_space<vmem>>) attributes {dimension_semantics = [#tpu.dimension_semantics<parallel>, #tpu.dimension_semantics<parallel>], iteration_bounds = array<i64: 1, 2>, scalar_prefetch = 0 : i64, scratch_operands = 0 : i64, tpu.core_type = #tpu.core_type<tc>, window_params = [{transform_indices = @transform_0, window_bounds = array<i64: 8, 512>}, {transform_indices = @transform_1, window_bounds = array<i64: 512, 128>}, {transform_indices = @transform_2, window_bounds = array<i64: 1, 128>}, {transform_indices = @transform_3, window_bounds = array<i64: 8, 128>}]} {
    %c0 = arith.constant 0 : index
    %c0_0 = arith.constant 0 : index
    %0 = vector.load %arg4[%c0, %c0_0] : memref<1x128xf32, #tpu.memory_space<vmem>>, vector<1x128xf32>
    %c0_1 = arith.constant 0 : index
    %c0_2 = arith.constant 0 : index
    %1 = vector.load %arg2[%c0_1, %c0_2] : memref<8x512xf32, #tpu.memory_space<vmem>>, vector<8x512xf32>
    %c0_3 = arith.constant 0 : index
    %c0_4 = arith.constant 0 : index
    %2 = vector.load %arg3[%c0_3, %c0_4] : memref<512x128xf32, #tpu.memory_space<vmem>>, vector<512x128xf32>
    %cst = arith.constant dense<0.000000e+00> : vector<8x128xf32>
    %3 = tpu.matmul %1, %2, %cst {dimension_numbers = #tpu.dot_dimension_numbers<[1], [0], [0], [1], [0, 0, 1, 1], [], []>} : vector<8x512xf32>, vector<512x128xf32>, vector<8x128xf32> -> vector<8x128xf32>
    %4 = vector.broadcast %0 : vector<1x128xf32> to vector<8x128xf32>
    %5 = arith.addf %4, %3 : vector<8x128xf32>
    %c0_5 = arith.constant 0 : index
    %c0_6 = arith.constant 0 : index
    %6 = vector.load %arg5[%c0_5, %c0_6] : memref<8x128xf32, #tpu.memory_space<vmem>>, vector<8x128xf32>
    tpu.vector_store %arg5[%c0_5, %c0_6], %5 {strides = array<i32>} : memref<8x128xf32, #tpu.memory_space<vmem>>, vector<8x128xf32>,
    return
  }
  func.func @transform_0(%arg0: i32, %arg1: i32) -> (i32, i32) {
    %c0_i32 = arith.constant 0 : i32
    %c0_i32_0 = arith.constant 0 : i32
    return %arg0, %c0_i32 : i32, i32
  }
  func.func @transform_1(%arg0: i32, %arg1: i32) -> (i32, i32) {
    %c0_i32 = arith.constant 0 : i32
    %c0_i32_0 = arith.constant 0 : i32
    return %c0_i32, %arg1 : i32, i32
  }
  func.func @transform_2(%arg0: i32, %arg1: i32) -> (i32, i32) {
    %c0_i32 = arith.constant 0 : i32
    %c0_i32_0 = arith.constant 0 : i32
    return %c0_i32, %arg1 : i32, i32
  }
  func.func @transform_3(%arg0: i32, %arg1: i32) -> (i32, i32) {
    %c0_i32 = arith.constant 0 : i32
    return %arg0, %arg1 : i32, i32
  }
}

</mosaic_0001>

<bundles_post_ra>
// kernel: simple_neural_network_forward.1
= control target key start
LH: loop header
LB: loop body
LE: loop exit
PB: predicated region body
PF: predicated region fallthrough
CT: control target
= control target key end

     0   :  { %8 = vsyncpa [#allocation3], 0  ;;  %s1262_s0 = inlined_call_operand.hbm [shape: f32[8,512], index: 0, kind: input, shape index: {}]   ;;  %s1263_s1 = inlined_call_operand.hbm [shape: f32[512,256], index: 1, kind: input, shape index: {}]   ;;  %s1264_s2 = inlined_call_operand.vmem [shape: f32[1,256], index: 2, kind: input, shape index: {}]   ;;  %s1265_s3 = inlined_call_operand.hbm [shape: f32[8,256], index: 3, kind: output, shape index: {}]  }
   0x1   :  { %9 = vsyncpa [#allocation6], 0 }
   0x2   :  { %11 = vsyncpa [#allocation6 + $0x1], 0 }
   0x3   :  { %12 = vsyncpa [#allocation4], 0 }
   0x4   :  { %14 = vsyncpa [#allocation4 + $0x1], 0  ;;  %s971_s12 = smov 0   ;;  %s973_s13 = smov 0  }
   0x5   :  { %s975_s14 = smov 0   ;;  %s977_s15 = smov 0  }
   0x6   :  { %s979_s16 = smov 0   ;;  %s981_s17 = smov 0  }
   0x7 LB: > { %s573_s18 = sadd.s32 4294967295, %s943_s17   ;;  %s574_s19 = sadd.s32 4294967294, %s943_s17   ;;  %s943_s17 = sphi %s981_s17, %s20_s17   ;;  %s939_s16 = sphi %s979_s16, %s1293_s16   ;;  %s935_s15 = sphi %s977_s15, %s1292_s15   ;;  %s931_s14 = sphi %s975_s14, %s1291_s14   ;;  %s927_s13 = sphi %s973_s13, %s1290_s13   ;;  %s923_s12 = sphi %s971_s12, %s1289_s12  }
   0x8   : > { %s65_s20 = sadd.s32 1, %s931_s14  ;;  %p72_p0 = scmp.ne.s32.totalorder %s931_s14, %s927_s13 }
   0x9   : > { %p73_p1 = scmp.eq.s32.totalorder %s943_s17, 0  ;;  %p78_p2 = scmp.ne.s32.totalorder %s927_s13, %s923_s12 }
   0xa   : > { %p1009_p3 = scmp.eq.s32.totalorder %s573_s18, 0  ;;  %p130_p4 = scmp.eq.s32.totalorder %s573_s18, 1 }
   0xb   : > { %p1013_p5 = por %p73_p1, %p72_p0  ;;  %p136_p6 = scmp.eq.s32.totalorder %s574_s19, 1 }
   0xc   : > { %s1272_s21 = scalar_select %p1009_p3, 1, 0 }
   0xd   : > { %p1019_p7 = por %p1009_p3, %p78_p2  ;;  %p1023_p8 = por %p130_p4, %p72_p0 }
   0xe   : > { %p1027_p9 = por %p136_p6, %p78_p2  ;;  %p575_p10 = scmp.ge.s32.totalorder %s943_s17, 1 }
   0xf   : > { %s1274_s23 = scalar_select %p1019_p7, 1, 0 }
  0x10   : > { %s1275_s24 = scalar_select %p1023_p8, 1, 0 }
  0x11   : > { %s1276_s25 = scalar_select %p1027_p9, 1, 0 }
  0x12   : > { %p143_p11 = scmp.lt.s32.totalorder %s943_s17, 3  ;;  %s945_s27 = smov [#allocation2]  }
  0x13   : > { %s159_s28 = sshll.u32 %s945_s27, 4  ;;  %p744_p1 = scmp.lt.s32.totalorder %s943_s17, 2  ;;  %s160_s28 = int_to_ptr.vmem [resolvable:$true] %s159_s28 }
  0x14   : > { %p1034_p13 = pnand %p575_p10, %p143_p11  ;;  %s29_s4 = sadd.s32 1, %s939_s16 }
  0x15   : > { %p1043_p4 = pnand %p744_p1, %p1013_p5  ;;  %p1054_p6 = scmp.ge.s32.totalorder %s29_s4, 2 }
  0x16   : > { %s1277_s26 = scalar_select %p1034_p13, 1, 0 }
  0x17   : > { %p731_p0 = pneg %p1034_p13  ;;  %s170_s6 = sand.u32 1, %s931_s14  }
  0x18   : > { %s1278_s29 = scalar_select %p1043_p4, 1, 0 }
  0x19   : > { %p1049_p2 = pnand %p731_p0, %p1009_p3  ;;  %s799_s9 = scalar_lea.hbm %s1262_s0, 512 }
  0x1a   : > { %s1280_s5 = scalar_select %p1054_p6, 1, 0 }
  0x1b   : > { %p800_p5 = scmp.ne.s32.totalorder %s1262_s0, %s799_s9  ;;  %p801_p10 = pneg %p1049_p2 }
  0x1c   : > { %p806_p0 = scmp.lt.u32.totalorder %s799_s9, %s1262_s0 }
  0x1d   : > { %p802_p11 = pnand %p801_p10, %p800_p5 }
  0x1f   : > { %p803_p1 = pneg %p802_p11 }
  0x21   : > { %p808_p12 = pnand %p806_p0, %p803_p1 }
  0x23   : > { %811 = shalt.err (!%p808_p12)
}
  0x24   : > { %s812_s22 = scalar_lea.vmem %s160_s28, 512  ;;  %p820_p3 = scmp.lt.s32.totalorder %s160_s28, %s160_s28 }
  0x25   : > { %p813_p9 = scmp.ne.s32.totalorder %s160_s28, %s812_s22  ;;  %p821_p13 = scmp.lt.s32.totalorder %s812_s22, %s812_s22 }
  0x27   : > { %p815_p8 = pnand %p813_p9, %p801_p10  ;;  %p822_p4 = por %p821_p13, %p820_p3 }
  0x29   : > { %p816_p7 = pneg %p815_p8 }
  0x2b   : > { %p823_p6 = pnand %p822_p4, %p816_p7 }
  0x2d   : > { %826 = shalt.err (!%p823_p6)
}
  0x2e   : > { %734 = dma.hbm_to_vmem [thread:$0]  (!%p1049_p2), %s1262_s0, 512, %s160_s28, [#allocation3]  }
  0x2f   : > { %p1281_p9 = scmp.ne.s32.totalorder %s1280_s5, 0  ;;  %s578_s8 = sshll.u32 %s170_s6, 9 }
  0x30   : > { %s579_s10 = sshll.u32 %s939_s16, 7  ;;  %s174_s19 = scalar_lea.vmem [#allocation5], %s578_s8 }
  0x31   : > { %s1295_s4 = smov (%p1281_p9, %s29_s4), 0  ;;  %s1085_s18 = scalar_lea.hbm %s1263_s1, %s579_s10 }
  0x32   : > { %s62_s9 = ssub.s32 %s939_s16, %s1295_s4  ;;  %s180_s22 = sshll.u32 %s174_s19, 4  ;;  %s1092_s22 = int_to_ptr.vmem [resolvable:$true] %s180_s22 }
  0x33   : > { %p63_p3 = scmp.eq.s32.totalorder %s62_s9, 0  ;;  %s1094_s5 = scalar_lea.sflag [#allocation6], %s170_s6 }
  0x34   : > { %s827_s27 = scalar_lea.hbm %s1085_s18, 8192  ;;  %p1282_p8 = scmp.ne.s32.totalorder %s1278_s29, 0 }
  0x35   : > { %s1090_s28 = scalar_select %p63_p3, %s931_s14, %s65_s20  }
  0x36   : > { %p828_p7 = scmp.ne.s32.totalorder %s1085_s18, %s827_s27  ;;  %p829_p12 = pneg %p1282_p8 }
  0x37   : > { %s832_s8 = scalar_lea.hbm %s1263_s1, 16384  ;;  %p833_p2 = scmp.lt.u32.totalorder %s1085_s18, %s1263_s1 }
  0x38   : > { %p830_p13 = pnand %p829_p12, %p828_p7  ;;  %p834_p6 = scmp.lt.u32.totalorder %s832_s8, %s827_s27 }
  0x39   : > { %p836_p10 = scmp.lt.u32.totalorder %s827_s27, %s1085_s18 }
  0x3a   : > { %p831_p4 = pneg %p830_p13  ;;  %p835_p5 = por %p834_p6, %p833_p2 }
  0x3c   : > { %p837_p11 = por %p836_p10, %p835_p5 }
  0x3e   : > { %p838_p1 = pnand %p837_p11, %p831_p4 }
  0x40   : > { %841 = shalt.err (!%p838_p1)
}
  0x41   : > { %s842_s20 = scalar_lea.vmem %s1092_s22, 8192  ;;  %s946_s6 = smov [#allocation5]  }
  0x42   : > { %p843_p0 = scmp.ne.s32.totalorder %s1092_s22, %s842_s20  ;;  %s847_s11 = sshll.u32 %s946_s6, 4  ;;  %s848_s11 = int_to_ptr.vmem [resolvable:$false] %s847_s11 }
  0x43   : > { %s849_s19 = scalar_lea.vmem %s848_s11, 16384  ;;  %p850_p7 = scmp.lt.s32.totalorder %s1092_s22, %s848_s11 }
  0x44   : > { %p845_p9 = pnand %p843_p0, %p829_p12  ;;  %p851_p13 = scmp.lt.s32.totalorder %s849_s19, %s842_s20 }
  0x46   : > { %p846_p3 = pneg %p845_p9  ;;  %p852_p2 = por %p851_p13, %p850_p7 }
  0x48   : > { %p853_p6 = pnand %p852_p2, %p846_p3 }
  0x4a   : > { %856 = shalt.err (!%p853_p6)
}
  0x4b   : > { %s947_s27 = smov 256   ;;  %s948_s7 = smov 128  }
  0x4c   : > { %s949_s9 = smov 8   ;;  %p1283_p12 = scmp.ne.s32.totalorder %s1277_s26, 0 }
  0x4d   : > { %738 = dma.hbm_to_vmem [thread:$0]  (!%p1282_p8), %s1085_s18, 8192, %s1092_s22, %s1094_s5, %s947_s27, %s948_s7, %s949_s9  }
  0x4e   : > { %198 = sbr.rel (%p1283_p12) target bundleno = 360 (0x168), region = 32  ;;  %p1284_p4 = scmp.ne.s32.totalorder (!%p1283_p12), %s1272_s21, 0 }
  0x55   : > { %910 = dma.done.wait (%p1284_p4), [#allocation3], 512  }
  0x56   : > { %912 = vsyncadd (%p1284_p4), [#allocation3], 4294966784  ;;  %s1129_s8 = sand.u32 1, %s927_s13   ;;  %p1285_p8 = scmp.ne.s32.totalorder %s1274_s23, 0 }
  0x57   : > { %s582_s10 = sshll.u32 %s1129_s8, 9  ;;  %s205_s30 = scalar_lea.sflag [#allocation6], %s1129_s8 }
  0x58   : > { %s1133_s20 = scalar_lea.vmem [#allocation5], %s582_s10 }
  0x59   : > { %914 = dma.done.wait (%p1285_p8), %s205_s30, 8192  }
  0x5a   : > { %916 = vsyncadd (%p1285_p8), %s205_s30, 4294959104  ;;  %v258_v0 = vld [vmem:[%s1133_s20 + $0x80] sm:$0xff]  ;;  %v259_v1 = vld [vmem:[%s1133_s20 + $0x88] sm:$0xff]  ;;  %p234_p5 = scmp.lt.s32.totalorder %s935_s15, 1  ;;  %s583_s23 = sshll.u32 %s1129_s8, 3 }
  0x5b   : > { %v290_v2 = vld [vmem:[%s1133_s20 + $0x180] sm:$0xff]  ;;  %v659_v3 = vpack.c.bf16 %v259_v1, %v258_v0  ;;  %v291_v4 = vld [vmem:[%s1133_s20 + $0x188] sm:$0xff]  ;;  %v260_v11 = vld [vmem:[%s1133_s20 + $0x90] sm:$0xff]  ;;  %s586_s22 = sshll.u32 %s935_s15, 7  ;;  %s233_s5 = scalar_lea.vmem [#allocation7], %s583_s23 }
  0x5c   : > { %v242_v5 = vld [vmem:[%s1133_s20] sm:$0xff]  ;;  %v243_v6 = vld [vmem:[%s1133_s20 + $0x8] sm:$0xff]  ;;  %v691_v7 = vpack.c.bf16 %v291_v4, %v290_v2  ;;  %v261_v13 = vld [vmem:[%s1133_s20 + $0x98] sm:$0xff]  ;;  %s235_s21 = scalar_select %p234_p5, %s935_s15, 1 }
  0x5d   : > { %v661_v8 = vpack.c.bf16 %v243_v6, %v242_v5  ;;  %v274_v9 = vld [vmem:[%s1133_s20 + $0x100] sm:$0xff]  ;;  %v275_v10 = vld [vmem:[%s1133_s20 + $0x108] sm:$0xff]  ;;  %660 = vmatprep.subr.bf16.mxu0 %v659_v3  ;;  %v292_v14 = vld [vmem:[%s1133_s20 + $0x190] sm:$0xff]  ;;  %v663_v16 = vpack.c.bf16 %v261_v13, %v260_v11  ;;  %s470_s6 = sshll.u32 %s233_s5, 4  ;;  %s1213_s27 = scalar_lea.hbm %s1265_s3, %s586_s22  ;;  %s1215_s6 = int_to_ptr.vmem [resolvable:$true] %s470_s6 }
  0x5e   : > { %v693_v12 = vpack.c.bf16 %v275_v10, %v274_v9  ;;  %v293_v15 = vld [vmem:[%s1133_s20 + $0x198] sm:$0xff]  ;;  %692 = vmatprep.subr.bf16.mxu1 %v691_v7  ;;  %v244_v18 = vld [vmem:[%s1133_s20 + $0x10] sm:$0xff]  ;;  %v262_v23 = vld [vmem:[%s1133_s20 + $0xa0] sm:$0xff]  ;;  %s236_s18 = scalar_lea.vmem %s1264_s2, %s235_s21  ;;  %s455_s7 = scalar_lea.sflag [#allocation4], %s1129_s8 }
  0x5f   : > { %662 = vmatpush3.bf16.msra.mxu0 %v661_v8  ;;  %v695_v17 = vpack.c.bf16 %v293_v15, %v292_v14  ;;  %v245_v19 = vld [vmem:[%s1133_s20 + $0x18] sm:$0xff]  ;;  %v276_v20 = vld [vmem:[%s1133_s20 + $0x110] sm:$0xff]  ;;  %v263_v24 = vld [vmem:[%s1133_s20 + $0xa8] sm:$0xff]  ;;  %s857_s9 = scalar_lea.vmem %s1215_s6, 128  ;;  %p1286_p11 = scmp.ne.s32.totalorder %s1275_s24, 0 }
  0x60   : > { %694 = vmatpush3.bf16.msra.mxu1 %v693_v12  ;;  %v665_v21 = vpack.c.bf16 %v245_v19, %v244_v18  ;;  %v277_v22 = vld [vmem:[%s1133_s20 + $0x118] sm:$0xff]  ;;  %664 = vmatprep.subr.bf16.mxu0 %v663_v16  ;;  %v667_v26 = vpack.c.bf16 %v263_v24, %v262_v23  ;;  %v294_v27 = vld [vmem:[%s1133_s20 + $0x1a0] sm:$0xff]  ;;  %v295_v28 = vld [vmem:[%s1133_s20 + $0x1a8] sm:$0xff]  ;;  %p858_p10 = scmp.ne.s32.totalorder %s1215_s6, %s857_s9  ;;  %s950_s15 = smov [#allocation7]  }
  0x61   : > { %696 = vmatprep.subr.bf16.mxu1 %v695_v17  ;;  %v697_v25 = vpack.c.bf16 %v277_v22, %v276_v20  ;;  %v246_v29 = vld [vmem:[%s1133_s20 + $0x20] sm:$0xff]  ;;  %v699_v30 = vpack.c.bf16 %v295_v28, %v294_v27  ;;  %v247_v31 = vld [vmem:[%s1133_s20 + $0x28] sm:$0xff]  ;;  %v264_v35 = vld [vmem:[%s1133_s20 + $0xb0] sm:$0xff]  ;;  %s861_s10 = sshll.u32 %s950_s15, 4  ;;  %s862_s10 = int_to_ptr.vmem [resolvable:$false] %s861_s10 }
  0x62   : > { %v278_v32 = vld [vmem:[%s1133_s20 + $0x120] sm:$0xff]  ;;  %v279_v33 = vld [vmem:[%s1133_s20 + $0x128] sm:$0xff]  ;;  %v669_v34 = vpack.c.bf16 %v247_v31, %v246_v29  ;;  %v265_v36 = vld [vmem:[%s1133_s20 + $0xb8] sm:$0xff]  ;;  %p859_p1 = pnand %p858_p10, %p1286_p11  ;;  %s863_s30 = scalar_lea.vmem %s862_s10, 256 }
  0x63   : > { %666 = vmatpush3.bf16.msra.mxu0 %v665_v21  ;;  %v296_v37 = vld [vmem:[%s1133_s20 + $0x1b0] sm:$0xff]  ;;  %v701_v38 = vpack.c.bf16 %v279_v33, %v278_v32  ;;  %v671_v39 = vpack.c.bf16 %v265_v36, %v264_v35  ;;  %v297_v40 = vld [vmem:[%s1133_s20 + $0x1b8] sm:$0xff]  ;;  %v266_v46 = vld [vmem:[%s1133_s20 + $0xc0] sm:$0xff]  ;;  %p864_p9 = scmp.lt.s32.totalorder %s1215_s6, %s862_s10  ;;  %p865_p3 = scmp.lt.s32.totalorder %s863_s30, %s857_s9 }
  0x64   : > { %698 = vmatpush3.bf16.msra.mxu1 %v697_v25  ;;  %668 = vmatprep.subr.bf16.mxu0 %v667_v26  ;;  %v248_v41 = vld [vmem:[%s1133_s20 + $0x30] sm:$0xff]  ;;  %v249_v42 = vld [vmem:[%s1133_s20 + $0x38] sm:$0xff]  ;;  %v703_v43 = vpack.c.bf16 %v297_v40, %v296_v37  ;;  %v267_v47 = vld [vmem:[%s1133_s20 + $0xc8] sm:$0xff]  ;;  %p860_p0 = pneg %p859_p1 }
  0x65   : > { %700 = vmatprep.subr.bf16.mxu1 %v699_v30  ;;  %v280_v44 = vld [vmem:[%s1133_s20 + $0x130] sm:$0xff]  ;;  %v281_v45 = vld [vmem:[%s1133_s20 + $0x138] sm:$0xff]  ;;  %v298_v48 = vld [vmem:[%s1133_s20 + $0x1c0] sm:$0xff]  ;;  %v673_v50 = vpack.c.bf16 %v249_v42, %v248_v41  ;;  %v675_v52 = vpack.c.bf16 %v267_v47, %v266_v46  ;;  %p866_p7 = por %p865_p3, %p864_p9 }
  0x66   : > { %v299_v49 = vld [vmem:[%s1133_s20 + $0x1c8] sm:$0xff]  ;;  %v705_v51 = vpack.c.bf16 %v281_v45, %v280_v44  ;;  %v250_v53 = vld [vmem:[%s1133_s20 + $0x40] sm:$0xff]  ;;  %v268_v58 = vld [vmem:[%s1133_s20 + $0xd0] sm:$0xff] }
  0x67   : > { %670 = vmatpush3.bf16.msra.mxu0 %v669_v34  ;;  %v251_v54 = vld [vmem:[%s1133_s20 + $0x48] sm:$0xff]  ;;  %v282_v55 = vld [vmem:[%s1133_s20 + $0x140] sm:$0xff]  ;;  %v707_v56 = vpack.c.bf16 %v299_v49, %v298_v48  ;;  %v269_v59 = vld [vmem:[%s1133_s20 + $0xd8] sm:$0xff]  ;;  %p867_p13 = pnand %p866_p7, %p860_p0 }
  0x68   : > { %702 = vmatpush3.bf16.msra.mxu1 %v701_v38  ;;  %672 = vmatprep.subr.bf16.mxu0 %v671_v39  ;;  %v283_v57 = vld [vmem:[%s1133_s20 + $0x148] sm:$0xff]  ;;  %v300_v60 = vld [vmem:[%s1133_s20 + $0x1d0] sm:$0xff]  ;;  %v301_v61 = vld [vmem:[%s1133_s20 + $0x1d8] sm:$0xff]  ;;  %v677_v62 = vpack.c.bf16 %v251_v54, %v250_v53  ;;  %v679_v0 = vpack.c.bf16 %v269_v59, %v268_v58 }
  0x69   : > { %704 = vmatprep.subr.bf16.mxu1 %v703_v43  ;;  %v709_v63 = vpack.c.bf16 %v283_v57, %v282_v55  ;;  %v252_v1 = vld [vmem:[%s1133_s20 + $0x50] sm:$0xff]  ;;  %v253_v2 = vld [vmem:[%s1133_s20 + $0x58] sm:$0xff]  ;;  %v711_v4 = vpack.c.bf16 %v301_v61, %v300_v60  ;;  %v270_v6 = vld [vmem:[%s1133_s20 + $0xe0] sm:$0xff] }
  0x6a   : > { %v284_v3 = vld [vmem:[%s1133_s20 + $0x150] sm:$0xff]  ;;  %v285_v5 = vld [vmem:[%s1133_s20 + $0x158] sm:$0xff]  ;;  %v271_v7 = vld [vmem:[%s1133_s20 + $0xe8] sm:$0xff]  ;;  %v681_v10 = vpack.c.bf16 %v253_v2, %v252_v1 }
  0x6b   : > { %674 = vmatpush3.bf16.msra.mxu0 %v673_v50  ;;  %v302_v8 = vld [vmem:[%s1133_s20 + $0x1e0] sm:$0xff]  ;;  %v303_v9 = vld [vmem:[%s1133_s20 + $0x1e8] sm:$0xff]  ;;  %v713_v13 = vpack.c.bf16 %v285_v5, %v284_v3  ;;  %v683_v14 = vpack.c.bf16 %v271_v7, %v270_v6  ;;  %v241_v17 = vld [vmem:[#allocation2 + $0x18] sm:$0xff] }
  0x6c   : > { %706 = vmatpush3.bf16.msra.mxu1 %v705_v51  ;;  %676 = vmatprep.subr.bf16.mxu0 %v675_v52  ;;  %v254_v11 = vld [vmem:[%s1133_s20 + $0x60] sm:$0xff]  ;;  %v255_v12 = vld [vmem:[%s1133_s20 + $0x68] sm:$0xff]  ;;  %v715_v18 = vpack.c.bf16 %v303_v9, %v302_v8  ;;  %v272_v20 = vld [vmem:[%s1133_s20 + $0xf0] sm:$0xff] }
  0x6d   : > { %708 = vmatprep.subr.bf16.mxu1 %v707_v56  ;;  %v286_v15 = vld [vmem:[%s1133_s20 + $0x160] sm:$0xff]  ;;  %v239_v16 = vld [vmem:[#allocation2 + $0x8] sm:$0xff]  ;;  %v273_v21 = vld [vmem:[%s1133_s20 + $0xf8] sm:$0xff]  ;;  %440 = vmatprep.mubr.f32.mxu1 %v241_v17  ;;  %v685_v24 = vpack.c.bf16 %v255_v12, %v254_v11 }
  0x6e   : > { %v287_v19 = vld [vmem:[%s1133_s20 + $0x168] sm:$0xff]  ;;  %370 = vmatprep.mubr.f32.mxu0 %v239_v16  ;;  %v304_v22 = vld [vmem:[%s1133_s20 + $0x1f0] sm:$0xff]  ;;  %v305_v23 = vld [vmem:[%s1133_s20 + $0x1f8] sm:$0xff]  ;;  %v687_v26 = vpack.c.bf16 %v273_v21, %v272_v20 }
  0x6f   : > { %678 = vmatpush3.bf16.msra.mxu0 %v677_v62  ;;  %v717_v25 = vpack.c.bf16 %v287_v19, %v286_v15  ;;  %v256_v27 = vld [vmem:[%s1133_s20 + $0x70] sm:$0xff]  ;;  %v257_v28 = vld [vmem:[%s1133_s20 + $0x78] sm:$0xff]  ;;  %v719_v29 = vpack.c.bf16 %v305_v23, %v304_v22  ;;  %v238_v34 = vld [vmem:[#allocation2] sm:$0xff] }
  0x70   : > { %710 = vmatpush3.bf16.msra.mxu1 %v709_v63  ;;  %680 = vmatprep.subr.bf16.mxu0 %v679_v0  ;;  %v288_v30 = vld [vmem:[%s1133_s20 + $0x170] sm:$0xff]  ;;  %v289_v31 = vld [vmem:[%s1133_s20 + $0x178] sm:$0xff]  ;;  %v689_v32 = vpack.c.bf16 %v257_v28, %v256_v27  ;;  %v584_v42 = vld [vmem:[%s236_s18] ss:$0 sm:$0xff] }
  0x71   : > { %712 = vmatprep.subr.bf16.mxu1 %v711_v4  ;;  %v721_v33 = vpack.c.bf16 %v289_v31, %v288_v30  ;;  %v240_v35 = vld [vmem:[#allocation2 + $0x10] sm:$0xff] }
  0x73   : > { %682 = vmatpush3.bf16.msra.mxu0 %v681_v10 }
  0x74   : > { %714 = vmatpush3.bf16.msra.mxu1 %v713_v13  ;;  %684 = vmatprep.subr.bf16.mxu0 %v683_v14 }
  0x75   : > { %716 = vmatprep.subr.bf16.mxu1 %v715_v18 }
  0x77   : > { %686 = vmatpush3.bf16.msra.mxu0 %v685_v24 }
  0x78   : > { %718 = vmatpush3.bf16.msra.mxu1 %v717_v25  ;;  %688 = vmatprep.subr.bf16.mxu0 %v687_v26 }
  0x79   : > { %720 = vmatprep.subr.bf16.mxu1 %v719_v29 }
  0x7b   : > { %690 = vmatpush3.bf16.msra.mxu0 %v689_v32 }
  0x7c   : > { %722 = vmatpush3.bf16.msra.mxu1 %v721_v33 }
  0x7e   : > { %371 = vmatmul.mubr.f32.vlgmr.msra.gmra.mrb[0].mxu0 %v238_v34 }
  0x7f   : > { %441 = vmatmul.mubr.f32.vlgmr.msra.gmra.mrb[0].mxu1 %v240_v35 }
 0x151   : > { %v621_v36 = vpop.f32.mrb[0].mxu0 }
 0x152   : > { %v656_v37 = vpop.f32.mrb[0].mxu1  ;;  %v622_v38 = vpop.f32.mrb[1].mxu0 }
 0x153   : > { %v623_v39 = vadd.f32 %v622_v38, %v621_v36  ;;  %v657_v40 = vpop.f32.mrb[1].mxu1 }
 0x154   : > { %v658_v41 = vadd.f32 %v657_v40, %v656_v37 }
 0x156   : > { %v443_v43 = vadd.f32 %v658_v41, %v623_v39 }
 0x158   : > { %v452_v44 = vadd.f32 %v584_v42, %v443_v43 }
 0x15a   : > { %453 = vst [vmem:[%s233_s5] sm:$0xff] %v452_v44 }
 0x15b   : > { %870 = shalt.err (!%p867_p13)
}
 0x15c   : > { %s871_s8 = scalar_lea.hbm %s1213_s27, 128  ;;  %s875_s23 = scalar_lea.hbm %s1265_s3, 256 }
 0x15d   : > { %p872_p2 = scmp.ne.s32.totalorder %s1213_s27, %s871_s8  ;;  %p876_p4 = scmp.lt.u32.totalorder %s1213_s27, %s1265_s3 }
 0x15e   : > { %p877_p8 = scmp.lt.u32.totalorder %s875_s23, %s871_s8  ;;  %p879_p10 = scmp.lt.u32.totalorder %s871_s8, %s1213_s27 }
 0x15f   : > { %p873_p6 = pnand %p872_p2, %p1286_p11 }
 0x160   : > { %p878_p5 = por %p877_p8, %p876_p4 }
 0x161   : > { %p874_p12 = pneg %p873_p6 }
 0x162   : > { %p880_p1 = por %p879_p10, %p878_p5 }
 0x164   : > { %p881_p0 = pnand %p880_p1, %p874_p12 }
 0x166   : > { %884 = shalt.err (!%p881_p0)
}
 0x167   : > { %729 = dma.vmem_to_hbm [thread:$0]  (%p1286_p11), %s1215_s6, 128, %s1213_s27, %s455_s7  }
 0x168 PF: > { %s482_s18 = sand.u32 1, %s923_s12   ;;  %p1287_p9 = scmp.ne.s32.totalorder %s1276_s25, 0 }
 0x169   : > { %p1288_p3 = scmp.ge.s32.totalorder %s943_s17, 2  ;;  %s483_s22 = scalar_lea.sflag [#allocation4], %s482_s18 }
 0x16b   : > { %p740_p7 = pnand %p1288_p3, %p1287_p9 }
 0x16d   : > { %918 = dma.done.wait (!%p740_p7), %s483_s22, 128  }
 0x16e   : > { %920 = vsyncadd (!%p740_p7), %s483_s22, 4294967168  ;;  %s20_s17 = sadd.s32 1, %s943_s17   ;;  %s1289_s12 = smov %s927_s13 }
 0x16f   : > { %p17_p13 = scmp.ge.s32.totalorder %s20_s17, 4   ;;  %s1290_s13 = smov %s931_s14 }
 0x170   : > { %s1291_s14 = smov %s1090_s28  ;;  %s1292_s15 = smov %s939_s16 }
 0x171   : > { %s1293_s16 = smov %s1295_s4  ;;  %19 = sbr.rel (!%p17_p13) target bundleno = 7 (0x7), region = 86 }
 0x178   :  { %488 = vsyncpa [#allocation3], 1 }
 0x179   :  { %490 = vsyncpa [#allocation3 + $0x1], 1 }
 0x17a   :  { %491 = vsyncpa [#allocation6], 1 }
 0x17b   :  { %493 = vsyncpa [#allocation6 + $0x1], 1 }
 0x17c   :  { %494 = vsyncpa [#allocation4], 1 }
 0x17d   :  { %496 = vsyncpa [#allocation4 + $0x1], 1 }

</bundles_post_ra>
